<compile_context>
chip_gen: v7x
topology: tpu7x:2x2x1
jax: 0.10.0
libtpu: 0.0.40
codegen_flags: <defaults>
</compile_context>

<pallas_src>
import jax
import jax.numpy as jnp
from jax.experimental import pallas as pl
from jax.experimental.pallas import tpu as pltpu


def _round_up(x: int, m: int) -> int:
    return (x + m - 1) // m * m


def _balanced_softmax_loss_kernel(
    logits_ref,   # (TILE_N, TILE_C) input dtype (f32 or bf16)   VMEM
    log_spc_ref,  # (1, TILE_C)      f32                         VMEM
    labels_ref,   # (TILE_N, 1)      i32                         VMEM (constant over k)
    out_ref,      # (TILE_N, 1)      f32 per-row loss            VMEM (revisited over k)
    m_sc,         # (TILE_N, 1) f32 running max        scratch
    l_sc,         # (TILE_N, 1) f32 running exp-sum    scratch
    corr_sc,      # (TILE_N, 1) f32 label-logit accum  scratch
):
    k = pl.program_id(1)

    @pl.when(k == 0)
    def _init():
        m_sc[...] = jnp.full_like(m_sc, -jnp.inf)
        l_sc[...] = jnp.zeros_like(l_sc)
        corr_sc[...] = jnp.zeros_like(corr_sc)

    # Upcast inside the kernel only (bf16 stays bf16 over HBM->VMEM DMA).
    bal = logits_ref[...].astype(jnp.float32) - log_spc_ref[...]        # (TN, TC)

    # --- online logsumexp over the class axis ---
    m_old = m_sc[...]                                                   # (TN, 1)
    m_new = jnp.maximum(m_old, jnp.max(bal, axis=-1, keepdims=True))    # (TN, 1)
    alpha = jnp.exp(m_old - m_new)                                      # rescale factor
    l_sc[...] = alpha * l_sc[...] + jnp.sum(jnp.exp(bal - m_new), axis=-1, keepdims=True)
    m_sc[...] = m_new

    # --- accumulate the true-class balanced logit for this C-tile ---
    tile_c = bal.shape[-1]
    col = jax.lax.broadcasted_iota(jnp.int32, bal.shape, 1) + k * tile_c
    hit = col == labels_ref[...]                                        # (TN, TC) bool
    corr_sc[...] += jnp.sum(jnp.where(hit, bal, 0.0), axis=-1, keepdims=True)

    @pl.when(k == pl.num_programs(1) - 1)
    def _finalize():
        lse = m_sc[...] + jnp.log(l_sc[...])
        out_ref[...] = (lse - corr_sc[...]).astype(out_ref.dtype)


def balanced_softmax_loss(logits, labels, sample_per_class, reduction="mean",
                          *, tile_n=256, tile_c=1024):
    """logits: (N, C) f32/bf16, labels: (N,) int, sample_per_class: (C,) positive counts."""
    n, c = logits.shape

    # Clamp tiles to the (padded) problem size; keep (8, 128) alignment.
    tile_n = min(tile_n, _round_up(n, 8))
    tile_c = min(tile_c, _round_up(c, 128))
    n_pad = _round_up(n, tile_n)
    c_pad = _round_up(c, tile_c)

    log_spc = jnp.log(sample_per_class.astype(jnp.float32)).reshape(1, c)
    if c_pad != c:
        # Pad classes with a huge log-count so exp(logit - log_spc) underflows to 0
        # and the padded classes never win the running max / label match.
        log_spc = jnp.pad(log_spc, ((0, 0), (0, c_pad - c)), constant_values=1e30)
        logits = jnp.pad(logits, ((0, 0), (0, c_pad - c)))
    if n_pad != n:
        logits = jnp.pad(logits, ((0, n_pad - n), (0, 0)))
        labels = jnp.pad(labels, (0, n_pad - n))
    labels_2d = labels.astype(jnp.int32).reshape(n_pad, 1)

    grid = (n_pad // tile_n, c_pad // tile_c)

    per_row = pl.pallas_call(
        _balanced_softmax_loss_kernel,
        out_shape=jax.ShapeDtypeStruct((n_pad, 1), jnp.float32),
        grid_spec=pltpu.PrefetchScalarGridSpec(
            num_scalar_prefetch=0,
            grid=grid,
            in_specs=[
                pl.BlockSpec((tile_n, tile_c), lambda i, k: (i, k)),   # logits
                pl.BlockSpec((1, tile_c), lambda i, k: (0, k)),        # log(spc)
                pl.BlockSpec((tile_n, 1), lambda i, k: (i, 0)),        # labels (no re-DMA per k)
            ],
            out_specs=pl.BlockSpec((tile_n, 1), lambda i, k: (i, 0)),  # per-row loss
            scratch_shapes=[
                pltpu.VMEM((tile_n, 1), jnp.float32),  # running max
                pltpu.VMEM((tile_n, 1), jnp.float32),  # running exp-sum
                pltpu.VMEM((tile_n, 1), jnp.float32),  # label-logit accumulator
            ],
        ),
        compiler_params=pltpu.CompilerParams(
            dimension_semantics=("parallel", "arbitrary"),
        ),
    )(logits, log_spc, labels_2d)

    per_row = per_row[:n, 0]  # drop padded rows; mean over the *real* batch only
    if reduction == "mean":
        return jnp.mean(per_row)
    if reduction == "sum":
        return jnp.sum(per_row)
    return per_row  # 'none'


def _reference(logits, labels, sample_per_class):
    """Pure-JAX reference of the PyTorch forward (sanity check only)."""
    bal = logits.astype(jnp.float32) - jnp.log(sample_per_class.astype(jnp.float32))[None, :]
    logp = jax.nn.log_softmax(bal, axis=-1)
    return -jnp.mean(jnp.take_along_axis(logp, labels[:, None], axis=-1))


if __name__ == "__main__":
    key = jax.random.PRNGKey(0)

    # Small classification-head shapes: batch=24, classes=300.
    N, C = 24, 300
    k1, k2 = jax.random.split(key)
    logits = jax.random.normal(k1, (N, C), dtype=jnp.float32)
    labels = jax.random.randint(k2, (N,), 0, C, dtype=jnp.int32)
    sample_per_class = jnp.arange(1, C + 1, dtype=jnp.float32)  # deterministic class counts

    ref = _reference(logits, labels, sample_per_class)

    # 1) Default tiles (single C tile after clamping, padded class axis).
    loss = balanced_softmax_loss(logits, labels, sample_per_class)
    jax.block_until_ready(loss)
    assert jnp.allclose(loss, ref, atol=1e-5, rtol=1e-5), (loss, ref)

    # 2) Force multi-tile grid: exercises the online logsumexp across C tiles,
    #    N tiling, and padding of both axes.
    loss_tiled = balanced_softmax_loss(logits, labels, sample_per_class, tile_n=8, tile_c=128)
    jax.block_until_ready(loss_tiled)
    assert jnp.allclose(loss_tiled, ref, atol=1e-5, rtol=1e-5), (loss_tiled, ref)

    # 3) bf16 input path: halves HBM bytes; upcast to f32 happens inside the kernel.
    logits_bf16 = logits.astype(jnp.bfloat16)
    loss_bf16 = balanced_softmax_loss(logits_bf16, labels, sample_per_class, tile_n=8, tile_c=128)
    jax.block_until_ready(loss_bf16)
    ref_bf16 = _reference(logits_bf16, labels, sample_per_class)
    assert jnp.allclose(loss_bf16, ref_bf16, atol=1e-4, rtol=1e-4), (loss_bf16, ref_bf16)

    print("KERNEL_OK")
</pallas_src>

<mosaic_0001>
module attributes {stable_mosaic.version = 11 : i64} {
  func.func @_balanced_softmax_loss_kernel(%arg0: i32, %arg1: i32, %arg2: memref<24x384xf32, #tpu.memory_space<vmem>>, %arg3: memref<1x384xf32, #tpu.memory_space<vmem>>, %arg4: memref<24x1xi32, #tpu.memory_space<vmem>>, %arg5: memref<24x1xf32, #tpu.memory_space<vmem>>, %arg6: memref<24x1xf32, #tpu.memory_space<vmem>>, %arg7: memref<24x1xf32, #tpu.memory_space<vmem>>, %arg8: memref<24x1xf32, #tpu.memory_space<vmem>>) attributes {dimension_semantics = [#tpu.dimension_semantics<parallel>, #tpu.dimension_semantics<arbitrary>], iteration_bounds = array<i64: 1, 1>, scalar_prefetch = 0 : i64, scratch_operands = 3 : i64, tpu.core_type = #tpu.core_type<tc>, window_params = [{transform_indices = @transform_0, window_bounds = array<i64: 24, 384>}, {transform_indices = @transform_1, window_bounds = array<i64: 1, 384>}, {transform_indices = @transform_2, window_bounds = array<i64: 24, 1>}, {transform_indices = @transform_3, window_bounds = array<i64: 24, 1>}]} {
    %c0_i32 = arith.constant 0 : i32
    %0 = arith.cmpi eq, %arg1, %c0_i32 : i32
    %1 = arith.extui %0 : i1 to i32
    %c0_i32_0 = arith.constant 0 : i32
    %2 = arith.cmpi ne, %1, %c0_i32_0 : i32
    scf.if %2 {
      %cst_23 = arith.constant 0xFF800000 : f32
      %40 = vector.broadcast %cst_23 : f32 to vector<24x1xf32>
      %c0_24 = arith.constant 0 : index
      %c0_25 = arith.constant 0 : index
      %41 = vector.load %arg6[%c0_24, %c0_25] : memref<24x1xf32, #tpu.memory_space<vmem>>, vector<24x1xf32>
      tpu.vector_store %arg6[%c0_24, %c0_25], %40 {strides = array<i32>} : memref<24x1xf32, #tpu.memory_space<vmem>>, vector<24x1xf32>,
      %cst_26 = arith.constant 0.000000e+00 : f32
      %42 = vector.broadcast %cst_26 : f32 to vector<24x1xf32>
      %c0_27 = arith.constant 0 : index
      %c0_28 = arith.constant 0 : index
      %43 = vector.load %arg7[%c0_27, %c0_28] : memref<24x1xf32, #tpu.memory_space<vmem>>, vector<24x1xf32>
      tpu.vector_store %arg7[%c0_27, %c0_28], %42 {strides = array<i32>} : memref<24x1xf32, #tpu.memory_space<vmem>>, vector<24x1xf32>,
      %cst_29 = arith.constant 0.000000e+00 : f32
      %44 = vector.broadcast %cst_29 : f32 to vector<24x1xf32>
      %c0_30 = arith.constant 0 : index
      %c0_31 = arith.constant 0 : index
      %45 = vector.load %arg8[%c0_30, %c0_31] : memref<24x1xf32, #tpu.memory_space<vmem>>, vector<24x1xf32>
      tpu.vector_store %arg8[%c0_30, %c0_31], %44 {strides = array<i32>} : memref<24x1xf32, #tpu.memory_space<vmem>>, vector<24x1xf32>,
    } else {
    }
    %c0 = arith.constant 0 : index
    %c0_1 = arith.constant 0 : index
    %3 = vector.load %arg2[%c0, %c0_1] : memref<24x384xf32, #tpu.memory_space<vmem>>, vector<24x384xf32>
    %c0_2 = arith.constant 0 : index
    %c0_3 = arith.constant 0 : index
    %4 = vector.load %arg3[%c0_2, %c0_3] : memref<1x384xf32, #tpu.memory_space<vmem>>, vector<1x384xf32>
    %5 = vector.broadcast %4 : vector<1x384xf32> to vector<24x384xf32>
    %6 = arith.subf %3, %5 : vector<24x384xf32>
    %c0_4 = arith.constant 0 : index
    %c0_5 = arith.constant 0 : index
    %7 = vector.load %arg6[%c0_4, %c0_5] : memref<24x1xf32, #tpu.memory_space<vmem>>, vector<24x1xf32>
    %cst = arith.constant dense<0xFF800000> : vector<24xf32>
    %8 = vector.multi_reduction <maximumf>, %6, %cst [1] : vector<24x384xf32> to vector<24xf32>
    %9 = vector.shape_cast %8 : vector<24xf32> to vector<24x1xf32>
    %10 = arith.maximumf %7, %9 : vector<24x1xf32>
    %11 = arith.subf %7, %10 : vector<24x1xf32>
    %12 = math.exp %11 : vector<24x1xf32>
    %c0_6 = arith.constant 0 : index
    %c0_7 = arith.constant 0 : index
    %13 = vector.load %arg7[%c0_6, %c0_7] : memref<24x1xf32, #tpu.memory_space<vmem>>, vector<24x1xf32>
    %14 = arith.mulf %12, %13 : vector<24x1xf32>
    %15 = vector.broadcast %10 : vector<24x1xf32> to vector<24x384xf32>
    %16 = arith.subf %6, %15 : vector<24x384xf32>
    %17 = math.exp %16 : vector<24x384xf32>
    %cst_8 = arith.constant dense<0.000000e+00> : vector<24xf32>
    %18 = vector.multi_reduction <add>, %17, %cst_8 [1] : vector<24x384xf32> to vector<24xf32>
    %19 = vector.shape_cast %18 : vector<24xf32> to vector<24x1xf32>
    %20 = arith.addf %14, %19 : vector<24x1xf32>
    %c0_9 = arith.constant 0 : index
    %c0_10 = arith.constant 0 : index
    %21 = vector.load %arg7[%c0_9, %c0_10] : memref<24x1xf32, #tpu.memory_space<vmem>>, vector<24x1xf32>
    tpu.vector_store %arg7[%c0_9, %c0_10], %20 {strides = array<i32>} : memref<24x1xf32, #tpu.memory_space<vmem>>, vector<24x1xf32>,
    %c0_11 = arith.constant 0 : index
    %c0_12 = arith.constant 0 : index
    %22 = vector.load %arg6[%c0_11, %c0_12] : memref<24x1xf32, #tpu.memory_space<vmem>>, vector<24x1xf32>
    tpu.vector_store %arg6[%c0_11, %c0_12], %10 {strides = array<i32>} : memref<24x1xf32, #tpu.memory_space<vmem>>, vector<24x1xf32>,
    %23 = tpu.iota {dimensions = array<i32: 1>} : vector<24x384xi32>
    %c384_i32 = arith.constant 384 : i32
    %24 = arith.muli %arg1, %c384_i32 : i32
    %25 = vector.broadcast %24 : i32 to vector<24x384xi32>
    %26 = arith.addi %23, %25 : vector<24x384xi32>
    %c0_13 = arith.constant 0 : index
    %c0_14 = arith.constant 0 : index
    %27 = vector.load %arg4[%c0_13, %c0_14] : memref<24x1xi32, #tpu.memory_space<vmem>>, vector<24x1xi32>
    %28 = vector.broadcast %27 : vector<24x1xi32> to vector<24x384xi32>
    %29 = arith.cmpi eq, %26, %28 : vector<24x384xi32>
    %c0_15 = arith.constant 0 : index
    %c0_16 = arith.constant 0 : index
    %30 = vector.load %arg8[%c0_15, %c0_16] : memref<24x1xf32, #tpu.memory_space<vmem>>, vector<24x1xf32>
    %cst_17 = arith.constant 0.000000e+00 : f32
    %31 = vector.broadcast %cst_17 : f32 to vector<24x384xf32>
    %32 = arith.select %29, %6, %31 : vector<24x384xi1>, vector<24x384xf32>
    %cst_18 = arith.constant dense<0.000000e+00> : vector<24xf32>
    %33 = vector.multi_reduction <add>, %32, %cst_18 [1] : vector<24x384xf32> to vector<24xf32>
    %34 = vector.shape_cast %33 : vector<24xf32> to vector<24x1xf32>
    %35 = arith.addf %30, %34 : vector<24x1xf32>
    %c0_19 = arith.constant 0 : index
    %c0_20 = arith.constant 0 : index
    %36 = vector.load %arg8[%c0_19, %c0_20] : memref<24x1xf32, #tpu.memory_space<vmem>>, vector<24x1xf32>
    tpu.vector_store %arg8[%c0_19, %c0_20], %35 {strides = array<i32>} : memref<24x1xf32, #tpu.memory_space<vmem>>, vector<24x1xf32>,
    %c0_i32_21 = arith.constant 0 : i32
    %37 = arith.cmpi eq, %arg1, %c0_i32_21 : i32
    %38 = arith.extui %37 : i1 to i32
    %c0_i32_22 = arith.constant 0 : i32
    %39 = arith.cmpi ne, %38, %c0_i32_22 : i32
    scf.if %39 {
      %c0_23 = arith.constant 0 : index
      %c0_24 = arith.constant 0 : index
      %40 = vector.load %arg6[%c0_23, %c0_24] : memref<24x1xf32, #tpu.memory_space<vmem>>, vector<24x1xf32>
      %c0_25 = arith.constant 0 : index
      %c0_26 = arith.constant 0 : index
      %41 = vector.load %arg7[%c0_25, %c0_26] : memref<24x1xf32, #tpu.memory_space<vmem>>, vector<24x1xf32>
      %42 = math.log %41 : vector<24x1xf32>
      %43 = arith.addf %40, %42 : vector<24x1xf32>
      %c0_27 = arith.constant 0 : index
      %c0_28 = arith.constant 0 : index
      %44 = vector.load %arg8[%c0_27, %c0_28] : memref<24x1xf32, #tpu.memory_space<vmem>>, vector<24x1xf32>
      %45 = arith.subf %43, %44 : vector<24x1xf32>
      %c0_29 = arith.constant 0 : index
      %c0_30 = arith.constant 0 : index
      %46 = vector.load %arg5[%c0_29, %c0_30] : memref<24x1xf32, #tpu.memory_space<vmem>>, vector<24x1xf32>
      tpu.vector_store %arg5[%c0_29, %c0_30], %45 {strides = array<i32>} : memref<24x1xf32, #tpu.memory_space<vmem>>, vector<24x1xf32>,
    } else {
    }
    return
  }
  func.func @transform_0(%arg0: i32, %arg1: i32) -> (i32, i32) {
    %c0_i32 = arith.constant 0 : i32
    return %arg0, %arg1 : i32, i32
  }
  func.func @transform_1(%arg0: i32, %arg1: i32) -> (i32, i32) {
    %c0_i32 = arith.constant 0 : i32
    %c0_i32_0 = arith.constant 0 : i32
    return %c0_i32, %arg1 : i32, i32
  }
  func.func @transform_2(%arg0: i32, %arg1: i32) -> (i32, i32) {
    %c0_i32 = arith.constant 0 : i32
    %c0_i32_0 = arith.constant 0 : i32
    return %arg0, %c0_i32 : i32, i32
  }
  func.func @transform_3(%arg0: i32, %arg1: i32) -> (i32, i32) {
    %c0_i32 = arith.constant 0 : i32
    %c0_i32_0 = arith.constant 0 : i32
    return %arg0, %c0_i32 : i32, i32
  }
}

</mosaic_0001>

<bundles_post_ra>
// kernel: tpu_custom_call.1
= control target key start
LH: loop header
LB: loop body
LE: loop exit
PB: predicated region body
PF: predicated region fallthrough
CT: control target
= control target key end

     0   :  { %8 = vsyncpa [#allocation6], 0  ;;  %s328_s12 = smov [#allocation5]   ;;  %s491_s0 = inlined_call_operand.hbm [shape: f32[24,384], index: 0, kind: input, shape index: {}]   ;;  %s492_s1 = inlined_call_operand.vmem [shape: f32[1,384], index: 1, kind: input, shape index: {}]   ;;  %s493_s2 = inlined_call_operand.vmem [shape: s32[24,1], index: 2, kind: input, shape index: {}]   ;;  %s494_s3 = inlined_call_operand.vmem [shape: f32[24,1], index: 3, kind: output, shape index: {}]  }
   0x1   :  { %s14_s13 = sshll.u32 %s328_s12, 4  ;;  %s304_s16 = scalar_lea.hbm %s491_s0, 1152  ;;  %s15_s13 = int_to_ptr.vmem [resolvable:$true] %s14_s13 }
   0x2   :  { %p305_p0 = scmp.ne.s32.totalorder %s491_s0, %s304_s16  ;;  %p308_p1 = scmp.lt.u32.totalorder %s304_s16, %s491_s0 }
   0x4   :  { %p310_p2 = pnand %p308_p1, %p305_p0 }
   0x6   :  { %313 = shalt.err (!%p310_p2)
}
   0x7   :  { %s314_s21 = scalar_lea.vmem %s15_s13, 1152  ;;  %p319_p4 = scmp.lt.s32.totalorder %s15_s13, %s15_s13 }
   0x8   :  { %p315_p3 = scmp.ne.s32.totalorder %s15_s13, %s314_s21  ;;  %p320_p5 = scmp.lt.s32.totalorder %s314_s21, %s314_s21 }
   0xa   :  { %p321_p6 = por %p320_p5, %p319_p4 }
   0xc   :  { %p322_p7 = pnand %p321_p6, %p315_p3 }
   0xe   :  { %325 = shalt.err (!%p322_p7)
}
   0xf   :  { %s329_s22 = smov 384   ;;  %s330_s23 = smov 24  }
  0x10   :  { %20 = dma.hbm_to_vmem [thread:$0]  %s491_s0, 1152, %s15_s13, [#allocation6], %s329_s22, %s329_s22, %s330_s23  }
  0x11   :  { %326 = dma.done.wait [#allocation6], 1152  }
  0x12   :  { %327 = vsyncadd [#allocation6], 4294966144  ;;  %v53_v0 = vlaneseq  ;;  %vm32_vm0 = vcmask 7168   ;;  %v331_v1 = vmov -inf   ;;  %v42_v6 = vld [vmem:[#allocation5] sm:$0xff]  ;;  %v43_v7 = vld [vmem:[#allocation5 + $0x8] sm:$0xff] }
  0x13   :  { %33 = vst.msk [vmem:[#allocation2] sm:$0xff] %vm32_vm0, %v331_v1  ;;  %34 = vst.msk [vmem:[#allocation2 + $0x8] sm:$0xff] %vm32_vm0, %v331_v1  ;;  %v44_v8 = vld [vmem:[#allocation5 + $0x10] sm:$0xff]  ;;  %v51_v9 = vld [vmem:[%s492_s1] sm:$0x7]  ;;  %v332_v34 = vmov 0  }
  0x14   :  { %35 = vst.msk [vmem:[#allocation2 + $0x10] sm:$0xff] %vm32_vm0, %v331_v1  ;;  %v54_v2 = vshrl.u32 %v53_v0, 7  ;;  %v48_v10 = vld [vmem:[#allocation5 + $0x30] sm:$0xff]  ;;  %v49_v14 = vld [vmem:[#allocation5 + $0x38] sm:$0xff]  ;;  %v50_v15 = vld [vmem:[#allocation5 + $0x40] sm:$0xff]  ;;  %272 = vset.pattern.permute.xlu1 %v332_v34  ;;  %273 = vset.pattern.permute.xlu0 %v332_v34  ;;  %v333_v35 = vmov 0.0  }
  0x15   :  { %v45_v16 = vld [vmem:[#allocation5 + $0x18] sm:$0xff]  ;;  %v46_v17 = vld [vmem:[#allocation5 + $0x20] sm:$0xff]  ;;  %v47_v18 = vld [vmem:[#allocation5 + $0x28] sm:$0xff]  ;;  %36 = vst.msk [vmem:[#allocation3] sm:$0xff] %vm32_vm0, %v333_v35 }
  0x16   :  { %v55_v3 = vsub.s32 0, %v54_v2  ;;  %v59_v4 = vsub.s32 1, %v54_v2  ;;  %v63_v5 = vsub.s32 2, %v54_v2  ;;  %37 = vst.msk [vmem:[#allocation3 + $0x8] sm:$0xff] %vm32_vm0, %v333_v35  ;;  %38 = vst.msk [vmem:[#allocation3 + $0x10] sm:$0xff] %vm32_vm0, %v333_v35  ;;  %v183_v48 = vld [vmem:[%s493_s2] sm:$0xff] }
  0x17   :  { %39 = vst.msk [vmem:[#allocation4] sm:$0xff] %vm32_vm0, %v333_v35  ;;  %40 = vst.msk [vmem:[#allocation4 + $0x8] sm:$0xff] %vm32_vm0, %v333_v35  ;;  %v184_v49 = vld [vmem:[%s493_s2 + $0x8] sm:$0xff]  ;;  %v185_v50 = vld [vmem:[%s493_s2 + $0x10] sm:$0xff] }
  0x18   :  { %v56_v11 = vrot.slane %v51_v9, %v55_v3  ;;  %v60_v12 = vrot.slane %v51_v9, %v59_v4  ;;  %v64_v13 = vrot.slane %v51_v9, %v63_v5  ;;  %41 = vst.msk [vmem:[#allocation4 + $0x10] sm:$0xff] %vm32_vm0, %v333_v35 }
  0x1a   :  { %v373_v19 = vsub.f32 %v42_v6, %v56_v11  ;;  %v375_v20 = vsub.f32 %v43_v7, %v60_v12  ;;  %v377_v21 = vsub.f32 %v44_v8, %v64_v13  ;;  %v379_v22 = vsub.f32 %v48_v10, %v56_v11  ;;  %v406_v36 = vld [vmem:[#allocation2] sm:$0xff]  ;;  %v416_v42 = vld [vmem:[#allocation2 + $0x8] sm:$0xff] }
  0x1b   :  { %v381_v23 = vsub.f32 %v49_v14, %v60_v12  ;;  %v383_v24 = vsub.f32 %v50_v15, %v64_v13  ;;  %v385_v25 = vsub.f32 %v45_v16, %v56_v11  ;;  %v389_v27 = vsub.f32 %v46_v17, %v60_v12  ;;  %v408_v37 = vld [vmem:[#allocation2 + $0x10] sm:$0xff] }
  0x1c   :  { %v80_v26 = vmax.f32 %v373_v19, %v377_v21  ;;  %v391_v28 = vsub.f32 %v47_v18, %v64_v13  ;;  %v175_v10 = vand.u32 127, %v53_v0 }
  0x1d   :  { %v88_v29 = vmax.f32 %v379_v22, %v383_v24 }
  0x1e   :  { %v81_v30 = vmax.f32 %v80_v26, %v375_v20  ;;  %v84_v31 = vmax.f32 %v385_v25, %v391_v28  ;;  %v176_v13 = vadd.s32 128, %v175_v10 }
  0x1f   :  { %v89_v32 = vmax.f32 %v88_v29, %v381_v23 }
  0x20   :  { %82 = vmax.xlane.f32.xlu0 %v81_v30  ;;  %v85_v33 = vmax.f32 %v84_v31, %v389_v27 }
  0x21   :  { %90 = vmax.xlane.f32.xlu1 %v89_v32 }
  0x24   :  { %86 = vmax.xlane.f32.xlu0 %v85_v33  ;;  %v177_v33 = vadd.s32 256, %v175_v10 }
  0xad   :  { %v83_v38 = vpop.xlane.xlu0 %82 }
  0xae   :  { %v411_v39 = vmax.f32 %v406_v36, %v83_v38  ;;  %v91_v40 = vpop.xlane.xlu1 %90 }
  0xaf   :  { %v414_v41 = vmax.f32 %v408_v37, %v91_v40 }
  0xb0   :  { %v95_v43 = vsub.f32 %v406_v36, %v411_v39  ;;  %171 = vst.msk [vmem:[#allocation2] sm:$0xff] %vm32_vm0, %v411_v39  ;;  %112 = vperm.xlu1 %272, %v411_v39  }
  0xb1   :  { %v97_v44 = vsub.f32 %v408_v37, %v414_v41  ;;  %173 = vst.msk [vmem:[#allocation2 + $0x10] sm:$0xff] %vm32_vm0, %v414_v41  ;;  %v87_v45 = vpop.xlane.xlu0 %86 }
  0xb2   :  { %v428_v46 = vmax.f32 %v416_v42, %v87_v45 }
  0xb4   :  { %v96_v47 = vsub.f32 %v416_v42, %v428_v46  ;;  %172 = vst.msk [vmem:[#allocation2 + $0x8] sm:$0xff] %vm32_vm0, %v428_v46  ;;  %117 = vperm.xlu0 %273, %v428_v46   ;;  %122 = vperm.xlu1 %272, %v414_v41  }
  0xb8   :  { %187 = vperm.xlu1 %272, %v183_v48  }
  0xbc   :  { %190 = vperm.xlu1 %272, %v184_v49  }
  0xc0   :  { %193 = vperm.xlu1 %272, %v185_v50  }
 0x12f   :  { %v113_v51 = vpop.permute.xlu1 %112 }
 0x130   :  { %v125_v52 = vsub.f32 %v373_v19, %v113_v51  ;;  %v126_v53 = vsub.f32 %v375_v20, %v113_v51  ;;  %v127_v54 = vsub.f32 %v377_v21, %v113_v51 }
 0x132   :  { %v134_v55 = vmul.f32 1.442695, %v125_v52  ;;  %v136_v56 = vmul.f32 1.442695, %v126_v53  ;;  %v138_v57 = vmul.f32 1.442695, %v127_v54 }
 0x133   :  { %v118_v58 = vpop.permute.xlu0 %117  ;;  %v123_v59 = vpop.permute.xlu1 %122 }
 0x134   :  { %274 = vpow2.f32 %v134_v55  ;;  %v128_v60 = vsub.f32 %v385_v25, %v118_v58  ;;  %v129_v61 = vsub.f32 %v389_v27, %v118_v58  ;;  %v130_v62 = vsub.f32 %v391_v28, %v118_v58  ;;  %v104_v58 = vld [vmem:[#allocation3] sm:$0xff] }
 0x135   :  { %276 = vpow2.f32 %v136_v56  ;;  %v131_v63 = vsub.f32 %v379_v22, %v123_v59  ;;  %v132_v1 = vsub.f32 %v381_v23, %v123_v59  ;;  %v133_v5 = vsub.f32 %v383_v24, %v123_v59 }
 0x136   :  { %v140_v2 = vmul.f32 1.442695, %v128_v60  ;;  %v142_v3 = vmul.f32 1.442695, %v129_v61  ;;  %v144_v4 = vmul.f32 1.442695, %v130_v62  ;;  %278 = vpow2.f32 %v138_v57 }
 0x137   :  { %v146_v6 = vmul.f32 1.442695, %v131_v63  ;;  %v188_v7 = vpop.permute.xlu1 %187  ;;  %v148_v8 = vmul.f32 1.442695, %v132_v1  ;;  %v150_v9 = vmul.f32 1.442695, %v133_v5 }
 0x138   :  { %280 = vpow2.f32 %v140_v2  ;;  %vm195_vm3 = vcmp.eq.s32.totalorder %v175_v10, %v188_v7  ;;  %vm196_vm4 = vcmp.eq.s32.totalorder %v176_v13, %v188_v7  ;;  %vm197_vm8 = vcmp.eq.s32.totalorder %v177_v33, %v188_v7  ;;  %v105_v61 = vld [vmem:[#allocation3 + $0x8] sm:$0xff]  ;;  %v204_v2 = vld [vmem:[#allocation4] sm:$0xff] }
 0x139   :  { %282 = vpow2.f32 %v142_v3  ;;  %v207_v35 = vsel %vm195_vm3, %v373_v19, 0.0  ;;  %v208_v45 = vsel %vm196_vm4, %v375_v20, 0.0  ;;  %v209_v20 = vsel %vm197_vm8, %v377_v21, 0.0  ;;  %v206_v63 = vld [vmem:[#allocation4 + $0x10] sm:$0xff] }
 0x13a   :  { %284 = vpow2.f32 %v144_v4  ;;  %v102_v21 = vmul.f32 1.442695, %v97_v44 }
 0x13b   :  { %286 = vpow2.f32 %v146_v6  ;;  %v191_v11 = vpop.permute.xlu1 %190  ;;  %v205_v6 = vld [vmem:[#allocation4 + $0x8] sm:$0xff] }
 0x13c   :  { %288 = vpow2.f32 %v148_v8  ;;  %vm198_vm6 = vcmp.eq.s32.totalorder %v175_v10, %v191_v11  ;;  %vm199_vm7 = vcmp.eq.s32.totalorder %v176_v13, %v191_v11  ;;  %vm200_vm9 = vcmp.eq.s32.totalorder %v177_v33, %v191_v11 }
 0x13d   :  { %290 = vpow2.f32 %v150_v9  ;;  %v210_v53 = vsel %vm198_vm6, %v385_v25, 0.0  ;;  %v211_v19 = vsel %vm199_vm7, %v389_v27, 0.0  ;;  %v212_v56 = vsel %vm200_vm9, %v391_v28, 0.0 }
 0x13e   :  { %v275_v12 = vpop.eup %274  ;;  %v220_v55 = vadd.f32 %v211_v19, %v210_v53  ;;  %v100_v25 = vmul.f32 1.442695, %v96_v47 }
 0x13f   :  { %v277_v14 = vpop.eup %276  ;;  %v194_v15 = vpop.permute.xlu1 %193 }
 0x140   :  { %vm201_vm1 = vcmp.eq.s32.totalorder %v175_v10, %v194_v15  ;;  %vm202_vm2 = vcmp.eq.s32.totalorder %v176_v13, %v194_v15  ;;  %v152_v16 = vadd.f32 %v277_v14, %v275_v12  ;;  %v279_v17 = vpop.eup %278  ;;  %vm203_vm5 = vcmp.eq.s32.totalorder %v177_v33, %v194_v15  ;;  %v237_v13 = vld [vmem:[#allocation2] sm:$0xff] }
 0x141   :  { %v213_v30 = vsel %vm201_vm1, %v379_v22, 0.0  ;;  %v214_v0 = vsel %vm202_vm2, %v381_v23, 0.0  ;;  %v216_v23 = vadd.f32 %v208_v45, %v207_v35  ;;  %v215_v51 = vsel %vm203_vm5, %v383_v24, 0.0 }
 0x142   :  { %v281_v18 = vpop.eup %280  ;;  %v153_v26 = vadd.f32 %v279_v17, %v152_v16  ;;  %v224_v48 = vadd.f32 %v214_v0, %v213_v30  ;;  %v221_v57 = vadd.f32 %v220_v55, %v212_v56  ;;  %v98_v24 = vmul.f32 1.442695, %v95_v43  ;;  %v106_v43 = vld [vmem:[#allocation3 + $0x10] sm:$0xff] }
 0x143   :  { %v283_v29 = vpop.eup %282  ;;  %v217_v54 = vadd.f32 %v216_v23, %v209_v20 }
 0x144   :  { %v285_v31 = vpop.eup %284  ;;  %154 = vadd.xlane.f32.xlu1 %v153_v26  ;;  %v156_v32 = vadd.f32 %v283_v29, %v281_v18  ;;  %v225_v52 = vadd.f32 %v224_v48, %v215_v51  ;;  %292 = vpow2.f32 %v98_v24  ;;  %v238_v26 = vld [vmem:[#allocation2 + $0x8] sm:$0xff] }
 0x145   :  { %v287_v34 = vpop.eup %286  ;;  %294 = vpow2.f32 %v100_v25 }
 0x146   :  { %v289_v38 = vpop.eup %288  ;;  %v157_v40 = vadd.f32 %v285_v31, %v156_v32  ;;  %296 = vpow2.f32 %v102_v21  ;;  %v239_v32 = vld [vmem:[#allocation2 + $0x10] sm:$0xff] }
 0x147   :  { %v160_v49 = vadd.f32 %v289_v38, %v287_v34  ;;  %v291_v50 = vpop.eup %290 }
 0x148   :  { %158 = vadd.xlane.f32.xlu0 %v157_v40 }
 0x149   :  { %v161_v22 = vadd.f32 %v291_v50, %v160_v49 }
 0x14b   :  { %162 = vadd.xlane.f32.xlu1 %v161_v22 }
 0x14c   :  { %226 = vadd.xlane.f32.xlu0 %v225_v52 }
 0x14e   :  { %v293_v27 = vpop.eup %292 }
 0x14f   :  { %218 = vadd.xlane.f32.xlu1 %v217_v54  ;;  %v107_v28 = vmul.f32 %v293_v27, %v104_v58  ;;  %v295_v59 = vpop.eup %294 }
 0x150   :  { %v297_v36 = vpop.eup %296  ;;  %v108_v39 = vmul.f32 %v295_v59, %v105_v61 }
 0x151   :  { %v109_v47 = vmul.f32 %v297_v36, %v106_v43 }
 0x153   :  { %222 = vadd.xlane.f32.xlu1 %v221_v57 }
 0x1d1   :  { %v155_v60 = vpop.xlane.xlu1 %154 }
 0x1d2   :  { %v164_v62 = vadd.f32 %v155_v60, %v107_v28 }
 0x1d4   :  { %168 = vst.msk [vmem:[#allocation3] sm:$0xff] %vm32_vm0, %v164_v62 }
 0x1d5   :  { %v159_v42 = vpop.xlane.xlu0 %158 }
 0x1d6   :  { %v165_v46 = vadd.f32 %v159_v42, %v108_v39 }
 0x1d8   :  { %169 = vst.msk [vmem:[#allocation3 + $0x8] sm:$0xff] %vm32_vm0, %v165_v46  ;;  %v163_v37 = vpop.xlane.xlu1 %162 }
 0x1d9   :  { %v166_v41 = vadd.f32 %v163_v37, %v109_v47  ;;  %v227_v44 = vpop.xlane.xlu0 %226 }
 0x1da   :  { %v230_v1 = vadd.f32 %v227_v44, %v206_v63 }
 0x1db   :  { %v240_v3 = vld [vmem:[#allocation3] sm:$0xff]  ;;  %170 = vst.msk [vmem:[#allocation3 + $0x10] sm:$0xff] %vm32_vm0, %v166_v41 }
 0x1dc   :  { %298 = vlog2.f32 %v240_v3  ;;  %233 = vst.msk [vmem:[#allocation4 + $0x10] sm:$0xff] %vm32_vm0, %v230_v1  ;;  %v219_v4 = vpop.xlane.xlu1 %218 }
 0x1dd   :  { %v228_v5 = vadd.f32 %v219_v4, %v204_v2 }
 0x1df   :  { %v241_v7 = vld [vmem:[#allocation3 + $0x8] sm:$0xff]  ;;  %231 = vst.msk [vmem:[#allocation4] sm:$0xff] %vm32_vm0, %v228_v5 }
 0x1e0   :  { %300 = vlog2.f32 %v241_v7  ;;  %v223_v8 = vpop.xlane.xlu1 %222 }
 0x1e1   :  { %v229_v9 = vadd.f32 %v223_v8, %v205_v6 }
 0x1e2   :  { %v242_v10 = vld [vmem:[#allocation3 + $0x10] sm:$0xff] }
 0x1e3   :  { %302 = vlog2.f32 %v242_v10  ;;  %232 = vst.msk [vmem:[#allocation4 + $0x8] sm:$0xff] %vm32_vm0, %v229_v9  ;;  %v254_v35 = vld [vmem:[#allocation4 + $0x10] sm:$0xff] }
 0x1e6   :  { %v299_v11 = vpop.eup %298  ;;  %v252_v16 = vld [vmem:[#allocation4] sm:$0xff] }
 0x1e7   :  { %v244_v12 = vmul.f32 0.6931472, %v299_v11 }
 0x1e9   :  { %v249_v14 = vadd.f32 %v244_v12, %v237_v13 }
 0x1ea   :  { %v301_v15 = vpop.eup %300  ;;  %v253_v31 = vld [vmem:[#allocation4 + $0x8] sm:$0xff] }
 0x1eb   :  { %v255_v17 = vsub.f32 %v249_v14, %v252_v16  ;;  %v246_v18 = vmul.f32 0.6931472, %v301_v15 }
 0x1ed   :  { %v303_v29 = vpop.eup %302  ;;  %258 = vst.msk [vmem:[%s494_s3] sm:$0xff] %vm32_vm0, %v255_v17  ;;  %v250_v30 = vadd.f32 %v246_v18, %v238_v26 }
 0x1ee   :  { %v248_v0 = vmul.f32 0.6931472, %v303_v29 }
 0x1ef   :  { %v256_v33 = vsub.f32 %v250_v30, %v253_v31 }
 0x1f0   :  { %v251_v34 = vadd.f32 %v248_v0, %v239_v32 }
 0x1f1   :  { %259 = vst.msk [vmem:[%s494_s3 + $0x8] sm:$0xff] %vm32_vm0, %v256_v33 }
 0x1f2   :  { %v257_v38 = vsub.f32 %v251_v34, %v254_v35 }
 0x1f4   :  { %260 = vst.msk [vmem:[%s494_s3 + $0x10] sm:$0xff] %vm32_vm0, %v257_v38 }
 0x1f5   :  { %265 = vsyncpa [#allocation6], 1 }

</bundles_post_ra>
